<compile_context>
chip_gen: v7x
topology: tpu7x:2x2x1
jax: 0.10.0
libtpu: 0.0.40
codegen_flags: <defaults>
</compile_context>

<pallas_src>
import jax
import jax.numpy as jnp
from jax import lax
from jax.experimental import pallas as pl
from jax.experimental.pallas import tpu as pltpu


def _round_up(x, m):
    return (x + m - 1) // m * m


def _vmem_capacity_bytes():
    try:
        info = pltpu.get_tpu_info()
        cap = getattr(info, "vmem_capacity_bytes", None)
        if cap:
            return int(cap)
    except Exception:
        pass
    return 64 * 1024 * 1024  # conservative default (v7x per-TC VMEM)


def _linear_kernel(x_ref, w_ref, b_ref, o_ref, acc_ref):
    # x_ref: (TM, TK); w_ref: (TN, TK) in PyTorch (dim_out, dim_in) layout;
    # b_ref: (1, TN); o_ref: (TM, TN); acc_ref: (TM, TN) f32 scratch.
    k = pl.program_id(2)

    @pl.when(k == 0)
    def _init():
        acc_ref[...] = jnp.zeros_like(acc_ref)

    # Contract X's last axis with W's last axis (i.e. X @ W^T) on the MXU,
    # accumulating in f32. No transposed copy of W is ever materialized.
    acc_ref[...] += lax.dot_general(
        x_ref[...], w_ref[...],
        dimension_numbers=(((1,), (1,)), ((), ())),
        preferred_element_type=jnp.float32,
    )

    @pl.when(k == pl.num_programs(2) - 1)
    def _store():
        o_ref[...] = (acc_ref[...] + b_ref[...].astype(jnp.float32)).astype(o_ref.dtype)


def linear_regression(x, w, b):
    """nn.Linear forward: x @ w.T + b.

    x: (B, dim_in), w: (dim_out, dim_in) (PyTorch layout), b: (dim_out,)
    returns: (B, dim_out)
    """
    B, K = x.shape
    N, K2 = w.shape
    assert K == K2 and b.shape == (N,)

    # Tiny problems: fixed per-call / per-grid-step overhead dominates and
    # XLA's fused dot is faster than a custom call.
    if B * K * N < 128 * 128 * 128:
        return (jnp.dot(x, w.T) + b).astype(x.dtype)

    itemsize = jnp.dtype(x.dtype).itemsize
    vmem_cap = _vmem_capacity_bytes()
    budget = (vmem_cap * 3) // 4  # ~48 MiB on v7x (64 MiB), ~96 MiB on v5e/v6e

    # --- K tile: never allow a partial block on the contraction axis. ---
    if K % 128 == 0:
        TK = 128
        for cand in range(min(512, K), 0, -128):
            if K % cand == 0:
                TK = cand
                break
    else:
        TK = K  # full-K block: legal for any K (block dim == full array dim)

    # --- N tile: lane-dense (multiple of 128) whenever N allows. ---
    TN = N if N <= 128 else min(256, _round_up(N, 128))

    # --- M tile: as big as the VMEM budget allows (both pipeline buffers of
    # every block are counted, plus the f32 accumulator). ---
    def footprint(tm):
        return ((2 * tm * TK           # X   (double-buffered)
                 + 2 * TN * TK         # W   (double-buffered)
                 + 2 * 8 * TN          # bias (sublane-padded, double-buffered)
                 + 2 * tm * TN)        # out (double-buffered)
                * itemsize
                + tm * TN * 4)         # f32 accumulator scratch

    TM = min(512, _round_up(B, 8))
    while TM > 8 and footprint(TM) > budget:
        TM = max(8, _round_up(TM // 2, 8))

    grid_m = pl.cdiv(B, TM)
    grid_n = pl.cdiv(N, TN)
    grid_k = pl.cdiv(K, TK)

    # v7x has 2 TensorCores: give the parallel (m, n) grid at least 2 steps so
    # it can actually be sharded. Costs nothing on 1-TC chips (v5e/v6e).
    if grid_m * grid_n == 1 and B > 8:
        TM = max(8, _round_up(-(-B // 2), 8))
        grid_m = pl.cdiv(B, TM)

    vmem_limit = int(min(vmem_cap - 8 * 1024 * 1024,
                         max(2 * footprint(TM), 32 * 1024 * 1024)))

    cost = pl.CostEstimate(
        flops=2 * B * K * N,
        transcendentals=0,
        bytes_accessed=(B * K + N * K + N + B * N) * itemsize,
    )

    b2d = b.reshape(1, N)  # metadata-only reshape, no HBM pass

    out = pl.pallas_call(
        _linear_kernel,
        out_shape=jax.ShapeDtypeStruct((B, N), x.dtype),
        grid_spec=pltpu.PrefetchScalarGridSpec(
            num_scalar_prefetch=0,
            grid=(grid_m, grid_n, grid_k),
            in_specs=[
                pl.BlockSpec((TM, TK), lambda i, j, k: (i, k)),   # X tile
                pl.BlockSpec((TN, TK), lambda i, j, k: (j, k)),   # W tile (N, K)
                pl.BlockSpec((1, TN), lambda i, j, k: (0, j)),    # bias tile
            ],
            out_specs=pl.BlockSpec((TM, TN), lambda i, j, k: (i, j)),
            scratch_shapes=[pltpu.VMEM((TM, TN), jnp.float32)],
        ),
        compiler_params=pltpu.CompilerParams(
            dimension_semantics=("parallel", "parallel", "arbitrary"),
            vmem_limit_bytes=vmem_limit,
        ),
        cost_estimate=cost,
    )(x, w, b2d)

    return out


def _make_case(key, batch, dim_in, dim_out):
    kx, kw, kb = jax.random.split(key, 3)
    x = jax.random.normal(kx, (batch, dim_in), dtype=jnp.float32)
    bound = 1.0 / (dim_in ** 0.5)  # mimic nn.Linear's default init
    w = jax.random.uniform(kw, (dim_out, dim_in), minval=-bound, maxval=bound,
                           dtype=jnp.float32)
    b = jax.random.uniform(kb, (dim_out,), minval=-bound, maxval=bound,
                           dtype=jnp.float32)
    return x, w, b


if __name__ == "__main__":
    key = jax.random.PRNGKey(0)
    keys = jax.random.split(key, 3)

    # (batch, dim_in, dim_out): aligned Pallas path, non-aligned (edge-clipping)
    # Pallas path, and a tiny case exercising the jnp fallback.
    cases = [(256, 512, 256), (100, 192, 200), (8, 32, 16)]

    for case_key, (batch, dim_in, dim_out) in zip(keys, cases):
        x, w, b = _make_case(case_key, batch, dim_in, dim_out)
        out = jax.block_until_ready(linear_regression(x, w, b))

        ref = jnp.dot(x, w.T, precision=lax.Precision.HIGHEST) + b
        assert out.shape == (batch, dim_out)
        assert jnp.allclose(out, ref, atol=1e-3, rtol=1e-3), (
            f"mismatch for case {(batch, dim_in, dim_out)}")

    print("KERNEL_OK")
</pallas_src>

<mosaic_0001>
module attributes {stable_mosaic.version = 11 : i64} {
  func.func @_linear_kernel(%arg0: i32, %arg1: i32, %arg2: i32, %arg3: memref<128x512xf32, #tpu.memory_space<vmem>>, %arg4: memref<256x512xf32, #tpu.memory_space<vmem>>, %arg5: memref<1x256xf32, #tpu.memory_space<vmem>>, %arg6: memref<128x256xf32, #tpu.memory_space<vmem>>, %arg7: memref<128x256xf32, #tpu.memory_space<vmem>>) attributes {dimension_semantics = [#tpu.dimension_semantics<parallel>, #tpu.dimension_semantics<parallel>, #tpu.dimension_semantics<arbitrary>], iteration_bounds = array<i64: 2, 1, 1>, scalar_prefetch = 0 : i64, scratch_operands = 1 : i64, tpu.core_type = #tpu.core_type<tc>, window_params = [{transform_indices = @transform_0, window_bounds = array<i64: 128, 512>}, {transform_indices = @transform_1, window_bounds = array<i64: 256, 512>}, {transform_indices = @transform_2, window_bounds = array<i64: 1, 256>}, {transform_indices = @transform_3, window_bounds = array<i64: 128, 256>}]} {
    %c0_i32 = arith.constant 0 : i32
    %0 = arith.cmpi eq, %arg2, %c0_i32 : i32
    %1 = arith.extui %0 : i1 to i32
    %c0_i32_0 = arith.constant 0 : i32
    %2 = arith.cmpi ne, %1, %c0_i32_0 : i32
    scf.if %2 {
      %cst_10 = arith.constant 0.000000e+00 : f32
      %12 = vector.broadcast %cst_10 : f32 to vector<128x256xf32>
      %c0_11 = arith.constant 0 : index
      %c0_12 = arith.constant 0 : index
      %13 = vector.load %arg7[%c0_11, %c0_12] : memref<128x256xf32, #tpu.memory_space<vmem>>, vector<128x256xf32>
      tpu.vector_store %arg7[%c0_11, %c0_12], %12 {strides = array<i32>} : memref<128x256xf32, #tpu.memory_space<vmem>>, vector<128x256xf32>,
    } else {
    }
    %c0 = arith.constant 0 : index
    %c0_1 = arith.constant 0 : index
    %3 = vector.load %arg7[%c0, %c0_1] : memref<128x256xf32, #tpu.memory_space<vmem>>, vector<128x256xf32>
    %c0_2 = arith.constant 0 : index
    %c0_3 = arith.constant 0 : index
    %4 = vector.load %arg3[%c0_2, %c0_3] : memref<128x512xf32, #tpu.memory_space<vmem>>, vector<128x512xf32>
    %c0_4 = arith.constant 0 : index
    %c0_5 = arith.constant 0 : index
    %5 = vector.load %arg4[%c0_4, %c0_5] : memref<256x512xf32, #tpu.memory_space<vmem>>, vector<256x512xf32>
    %cst = arith.constant dense<0.000000e+00> : vector<128x256xf32>
    %6 = tpu.matmul %4, %5, %cst {dimension_numbers = #tpu.dot_dimension_numbers<[1], [1], [0], [0], [0, 0, 1, 0], [], []>} : vector<128x512xf32>, vector<256x512xf32>, vector<128x256xf32> -> vector<128x256xf32>
    %7 = arith.addf %3, %6 : vector<128x256xf32>
    %c0_6 = arith.constant 0 : index
    %c0_7 = arith.constant 0 : index
    %8 = vector.load %arg7[%c0_6, %c0_7] : memref<128x256xf32, #tpu.memory_space<vmem>>, vector<128x256xf32>
    tpu.vector_store %arg7[%c0_6, %c0_7], %7 {strides = array<i32>} : memref<128x256xf32, #tpu.memory_space<vmem>>, vector<128x256xf32>,
    %c0_i32_8 = arith.constant 0 : i32
    %9 = arith.cmpi eq, %arg2, %c0_i32_8 : i32
    %10 = arith.extui %9 : i1 to i32
    %c0_i32_9 = arith.constant 0 : i32
    %11 = arith.cmpi ne, %10, %c0_i32_9 : i32
    scf.if %11 {
      %c0_10 = arith.constant 0 : index
      %c0_11 = arith.constant 0 : index
      %12 = vector.load %arg7[%c0_10, %c0_11] : memref<128x256xf32, #tpu.memory_space<vmem>>, vector<128x256xf32>
      %c0_12 = arith.constant 0 : index
      %c0_13 = arith.constant 0 : index
      %13 = vector.load %arg5[%c0_12, %c0_13] : memref<1x256xf32, #tpu.memory_space<vmem>>, vector<1x256xf32>
      %14 = vector.broadcast %13 : vector<1x256xf32> to vector<128x256xf32>
      %15 = arith.addf %12, %14 : vector<128x256xf32>
      %c0_14 = arith.constant 0 : index
      %c0_15 = arith.constant 0 : index
      %16 = vector.load %arg6[%c0_14, %c0_15] : memref<128x256xf32, #tpu.memory_space<vmem>>, vector<128x256xf32>
      tpu.vector_store %arg6[%c0_14, %c0_15], %15 {strides = array<i32>} : memref<128x256xf32, #tpu.memory_space<vmem>>, vector<128x256xf32>,
    } else {
    }
    return
  }
  func.func @transform_0(%arg0: i32, %arg1: i32, %arg2: i32) -> (i32, i32) {
    %c0_i32 = arith.constant 0 : i32
    return %arg0, %arg2 : i32, i32
  }
  func.func @transform_1(%arg0: i32, %arg1: i32, %arg2: i32) -> (i32, i32) {
    %c0_i32 = arith.constant 0 : i32
    return %arg1, %arg2 : i32, i32
  }
  func.func @transform_2(%arg0: i32, %arg1: i32, %arg2: i32) -> (i32, i32) {
    %c0_i32 = arith.constant 0 : i32
    %c0_i32_0 = arith.constant 0 : i32
    return %c0_i32, %arg1 : i32, i32
  }
  func.func @transform_3(%arg0: i32, %arg1: i32, %arg2: i32) -> (i32, i32) {
    %c0_i32 = arith.constant 0 : i32
    return %arg0, %arg1 : i32, i32
  }
}

</mosaic_0001>

<bundles_post_ra>
// kernel: tpu_custom_call.1
= control target key start
LH: loop header
LB: loop body
LE: loop exit
PB: predicated region body
PF: predicated region fallthrough
CT: control target
= control target key end

     0   :  { %8 = vsyncpa [#allocation4], 0  ;;  %s1959_s0 = inlined_call_operand.hbm [shape: f32[256,512], index: 0, kind: input, shape index: {}]   ;;  %s1960_s1 = inlined_call_operand.hbm [shape: f32[256,512], index: 1, kind: input, shape index: {}]   ;;  %s1961_s2 = inlined_call_operand.vmem [shape: f32[1,256], index: 2, kind: input, shape index: {}]   ;;  %s1962_s3 = inlined_call_operand.hbm [shape: f32[256,256], index: 3, kind: output, shape index: {}]  }
   0x1   :  { %10 = vsyncpa [#allocation4 + $0x1], 0 }
   0x2   :  { %11 = vsyncpa [#allocation7], 0 }
   0x3   :  { %12 = vsyncpa [#allocation5], 0 }
   0x4   :  { %14 = vsyncpa [#allocation5 + $0x1], 0  ;;  %s1593_s12 = smov 0   ;;  %s1595_s13 = smov 0  }
   0x5   :  { %s1597_s14 = smov 0   ;;  %s1599_s15 = smov 0  }
   0x6   :  { %s1601_s16 = smov 0   ;;  %s1603_s17 = smov 0  }
   0x7 LB: > { %s1159_s18 = sadd.s32 4294967295, %s1564_s17   ;;  %s1160_s19 = sadd.s32 4294967294, %s1564_s17   ;;  %s1564_s17 = sphi %s1603_s17, %s20_s17   ;;  %s1560_s16 = sphi %s1601_s16, %s1986_s16   ;;  %s1556_s15 = sphi %s1599_s15, %s1985_s15   ;;  %s1552_s14 = sphi %s1597_s14, %s1984_s14   ;;  %s1548_s13 = sphi %s1595_s13, %s1983_s13   ;;  %s1544_s12 = sphi %s1593_s12, %s1982_s12  }
   0x8   : > { %p61_p0 = scmp.ne.s32.totalorder %s1548_s13, %s1544_s12  ;;  %p1627_p1 = scmp.eq.s32.totalorder %s1159_s18, 0 }
   0x9   : > { %p1631_p2 = scmp.eq.s32.totalorder %s1159_s18, 1  ;;  %p147_p3 = scmp.eq.s32.totalorder %s1160_s19, 1 }
   0xa   : > { %s1967_s20 = scalar_select %p1627_p1, 1, 0 }
   0xb   : > { %s1968_s21 = scalar_select %p1631_p2, 1, 0 }
   0xc   : > { %p1637_p4 = por %p1627_p1, %p61_p0  ;;  %p1161_p5 = scmp.ge.s32.totalorder %s1564_s17, 1 }
   0xd   : > { %p1642_p6 = por %p147_p3, %p61_p0  ;;  %p154_p7 = scmp.lt.s32.totalorder %s1564_s17, 3 }
   0xe   : > { %s1969_s22 = scalar_select %p1637_p4, 1, 0 }
   0xf   : > { %s1970_s23 = scalar_select %p1642_p6, 1, 0 }
  0x10   : > { %p1647_p8 = pnand %p1161_p5, %p154_p7  ;;  %s1566_s25 = smov [#allocation6]  }
  0x11   : > { %s172_s26 = sshll.u32 %s1566_s25, 4  ;;  %s39_s28 = sadd.s32 1, %s1560_s16  ;;  %s173_s26 = int_to_ptr.vmem [resolvable:$true] %s172_s26 }
  0x12   : > { %s1971_s24 = scalar_select %p1647_p8, 1, 0 }
  0x13   : > { %p1351_p9 = pneg %p1647_p8  ;;  %s1420_s4 = scalar_lea.hbm %s1960_s1, 16384 }
  0x14   : > { %p1421_p12 = scmp.ne.s32.totalorder %s1960_s1, %s1420_s4  ;;  %p1427_p5 = scmp.lt.u32.totalorder %s1420_s4, %s1960_s1 }
  0x15   : > { %p1656_p11 = pnand %p1351_p9, %p1627_p1 }
  0x17   : > { %p1422_p13 = pneg %p1656_p11 }
  0x19   : > { %p1423_p0 = pnand %p1422_p13, %p1421_p12 }
  0x1b   : > { %p1424_p3 = pneg %p1423_p0 }
  0x1d   : > { %p1429_p7 = pnand %p1427_p5, %p1424_p3 }
  0x1f   : > { %1432 = shalt.err (!%p1429_p7)
}
  0x20   : > { %s1433_s9 = scalar_lea.vmem %s173_s26, 16384  ;;  %p1441_p1 = scmp.lt.s32.totalorder %s173_s26, %s173_s26 }
  0x21   : > { %p1434_p9 = scmp.ne.s32.totalorder %s173_s26, %s1433_s9  ;;  %p1442_p4 = scmp.lt.s32.totalorder %s1433_s9, %s1433_s9 }
  0x23   : > { %p1436_p10 = pnand %p1434_p9, %p1422_p13  ;;  %p1443_p8 = por %p1442_p4, %p1441_p1 }
  0x25   : > { %p1437_p6 = pneg %p1436_p10 }
  0x27   : > { %p1444_p2 = pnand %p1443_p8, %p1437_p6 }
  0x29   : > { %1447 = shalt.err (!%p1444_p2)
}
  0x2a   : > { %s1567_s10 = smov 512   ;;  %s1568_s11 = smov 32  }
  0x2b   : > { %1354 = dma.hbm_to_vmem [thread:$0]  (!%p1656_p11), %s1960_s1, 16384, %s173_s26, [#allocation7], %s1567_s10, %s1567_s10, %s1568_s11  }
  0x2c   : > { %p41_p1 = scmp.ge.s32.totalorder %s39_s28, 2  ;;  %s48_s25 = sadd.s32 1, %s1552_s14 }
  0x2d   : > { %p55_p2 = scmp.ne.s32.totalorder %s1552_s14, %s1548_s13  ;;  %p56_p4 = scmp.eq.s32.totalorder %s1564_s17, 0 }
  0x2e   : > { %s1988_s28 = smov (%p41_p1, %s39_s28), 0  ;;  %p1974_p8 = scmp.ne.s32.totalorder %s1968_s21, 0 }
  0x2f   : > { %p1686_p6 = por %p56_p4, %p55_p2  ;;  %s43_s30 = ssub.s32 %s1560_s16, %s1988_s28 }
  0x30   : > { %p1692_p10 = por %p1974_p8, %p55_p2  ;;  %p1364_p12 = scmp.lt.s32.totalorder %s1564_s17, 2 }
  0x31   : > { %p46_p11 = scmp.eq.s32.totalorder %s43_s30, 0  ;;  %s194_s26 = sand.u32 1, %s1552_s14  }
  0x32   : > { %s1165_s4 = sshll.u32 %s194_s26, 9  ;;  %s1180_s6 = sshll.u32 %s1560_s16, 13 }
  0x33   : > { %s1701_s5 = scalar_select %p46_p11, %s1552_s14, %s48_s25  }
  0x34   : > { %s1707_s9 = scalar_lea.hbm %s1959_s0, %s1180_s6  ;;  %s198_s21 = scalar_lea.vmem [#allocation3], %s1165_s4 }
  0x35   : > { %s208_s18 = sshll.u32 %s198_s21, 4  ;;  %p1713_p13 = pnand %p1364_p12, %p1686_p6  ;;  %s1709_s18 = int_to_ptr.vmem [resolvable:$true] %s208_s18 }
  0x36   : > { %s1717_s25 = scalar_lea.sflag [#allocation4], %s194_s26  ;;  %s1448_s30 = scalar_lea.hbm %s1707_s9, 8192 }
  0x37   : > { %p1449_p0 = scmp.ne.s32.totalorder %s1707_s9, %s1448_s30  ;;  %p1450_p3 = pneg %p1713_p13 }
  0x38   : > { %s1453_s29 = scalar_lea.hbm %s1959_s0, 16384  ;;  %p1454_p9 = scmp.lt.u32.totalorder %s1707_s9, %s1959_s0 }
  0x39   : > { %p1451_p5 = pnand %p1450_p3, %p1449_p0  ;;  %p1455_p1 = scmp.lt.u32.totalorder %s1453_s29, %s1448_s30 }
  0x3a   : > { %p1457_p4 = scmp.lt.u32.totalorder %s1448_s30, %s1707_s9 }
  0x3b   : > { %p1452_p7 = pneg %p1451_p5  ;;  %p1456_p2 = por %p1455_p1, %p1454_p9 }
  0x3d   : > { %p1458_p6 = por %p1457_p4, %p1456_p2 }
  0x3f   : > { %p1459_p8 = pnand %p1458_p6, %p1452_p7 }
  0x41   : > { %1462 = shalt.err (!%p1459_p8)
}
  0x42   : > { %s1463_s26 = scalar_lea.vmem %s1709_s18, 8192  ;;  %s1569_s21 = smov [#allocation3]  }
  0x43   : > { %p1464_p12 = scmp.ne.s32.totalorder %s1709_s18, %s1463_s26  ;;  %s1468_s4 = sshll.u32 %s1569_s21, 4  ;;  %s1469_s4 = int_to_ptr.vmem [resolvable:$false] %s1468_s4 }
  0x44   : > { %s1470_s6 = scalar_lea.vmem %s1469_s4, 16384  ;;  %p1471_p5 = scmp.lt.s32.totalorder %s1709_s18, %s1469_s4 }
  0x45   : > { %p1466_p11 = pnand %p1464_p12, %p1450_p3  ;;  %p1472_p9 = scmp.lt.s32.totalorder %s1470_s6, %s1463_s26 }
  0x47   : > { %p1467_p0 = pneg %p1466_p11  ;;  %p1473_p1 = por %p1472_p9, %p1471_p5 }
  0x49   : > { %p1474_p2 = pnand %p1473_p1, %p1467_p0 }
  0x4b   : > { %1477 = shalt.err (!%p1474_p2)
}
  0x4c   : > { %1358 = dma.hbm_to_vmem [thread:$0]  (!%p1713_p13), %s1707_s9, 8192, %s1709_s18, %s1717_s25, %s1567_s10, %s1567_s10, %s1568_s11  }
  0x4d   : > { %p1977_p3 = scmp.ne.s32.totalorder %s1971_s24, 0 }
  0x4e   : > { %s1751_s30 = sand.u32 (!%p1977_p3), 1, %s1548_s13   ;;  %p1978_p7 = scmp.ne.s32.totalorder (!%p1977_p3), %s1969_s22, 0 }
  0x4f   : > { %220 = sbr.rel (%p1977_p3) target bundleno = 515 (0x203), region = 32  ;;  %s1170_s29 = sshll.u32 (!%p1977_p3), %s1751_s30, 9 }
  0x50   : > { %s223_s7 = scalar_lea.sflag (!%p1977_p3), [#allocation4], %s1751_s30  ;;  %s1755_s8 = scalar_lea.vmem (!%p1977_p3), [#allocation3], %s1170_s29 }
  0x56   : > { %1531 = dma.done.wait (%p1978_p7), %s223_s7, 8192  }
  0x57   : > { %1533 = vsyncadd (%p1978_p7), %s223_s7, 4294959104  ;;  %p1979_p13 = scmp.ne.s32.totalorder %s1967_s20, 0 }
  0x59   : > { %1535 = dma.done.wait (%p1979_p13), [#allocation7], 16384  }
  0x5a   : > { %1537 = vsyncadd (%p1979_p13), [#allocation7], 4294950912  ;;  %v401_v0 = vld [vmem:[#allocation6 + $0x8] sm:$0xff]  ;;  %v403_v2 = vld [vmem:[#allocation6 + $0x18] sm:$0xff]  ;;  %s1172_s24 = sshll.u32 %s1751_s30, 8  ;;  %s1182_s11 = sshll.u32 %s1556_s15, 12 }
  0x5b   : > { %v405_v1 = vld [vmem:[#allocation6 + $0x28] sm:$0xff]  ;;  %v407_v4 = vld [vmem:[#allocation6 + $0x38] sm:$0xff]  ;;  %v400_v5 = vld [vmem:[#allocation6] sm:$0xff]  ;;  %s1839_s10 = scalar_lea.vmem [#allocation8], %s1172_s24  ;;  %s1905_s25 = scalar_lea.hbm %s1962_s3, %s1182_s11 }
  0x5c   : > { %v1183_v3 = vpack.c.bf16 %v405_v1, %v401_v0  ;;  %v404_v6 = vld [vmem:[#allocation6 + $0x20] sm:$0xff]  ;;  %v1247_v7 = vpack.c.bf16 %v407_v4, %v403_v2  ;;  %v402_v9 = vld [vmem:[#allocation6 + $0x10] sm:$0xff]  ;;  %v409_v11 = vld [vmem:[#allocation6 + $0x48] sm:$0xff]  ;;  %s1042_s9 = sshll.u32 %s1839_s10, 4  ;;  %s1026_s15 = scalar_lea.sflag [#allocation5], %s1751_s30  ;;  %s1907_s9 = int_to_ptr.vmem [resolvable:$true] %s1042_s9 }
  0x5d   : > { %v1185_v8 = vpack.c.bf16 %v404_v6, %v400_v5  ;;  %v406_v10 = vld [vmem:[#allocation6 + $0x30] sm:$0xff]  ;;  %v413_v13 = vld [vmem:[#allocation6 + $0x68] sm:$0xff]  ;;  %v411_v14 = vld [vmem:[#allocation6 + $0x58] sm:$0xff]  ;;  %s1478_s26 = scalar_lea.vmem %s1907_s9, 4096  ;;  %s1570_s21 = smov [#allocation8]  }
  0x5e   : > { %1184 = vmatprep.subr.bf16.mxu1 %v1183_v3  ;;  %v1249_v12 = vpack.c.bf16 %v406_v10, %v402_v9  ;;  %v415_v15 = vld [vmem:[#allocation6 + $0x78] sm:$0xff]  ;;  %1248 = vmatprep.subr.bf16.mxu0 %v1247_v7  ;;  %v1187_v16 = vpack.c.bf16 %v413_v13, %v409_v11  ;;  %v408_v18 = vld [vmem:[#allocation6 + $0x40] sm:$0xff]  ;;  %v410_v20 = vld [vmem:[#allocation6 + $0x50] sm:$0xff]  ;;  %p1479_p4 = scmp.ne.s32.totalorder %s1907_s9, %s1478_s26  ;;  %s1482_s4 = sshll.u32 %s1570_s21, 4  ;;  %s1483_s4 = int_to_ptr.vmem [resolvable:$false] %s1482_s4 }
  0x5f   : > { %1186 = vmatpush1.bf16.xpose.msra.mxu1 %v1185_v8  ;;  %v1251_v17 = vpack.c.bf16 %v415_v15, %v411_v14  ;;  %v412_v19 = vld [vmem:[#allocation6 + $0x60] sm:$0xff]  ;;  %v414_v21 = vld [vmem:[#allocation6 + $0x70] sm:$0xff]  ;;  %v417_v22 = vld [vmem:[#allocation6 + $0x88] sm:$0xff]  ;;  %s1484_s6 = scalar_lea.vmem %s1483_s4, 8192  ;;  %p1485_p12 = scmp.lt.s32.totalorder %s1907_s9, %s1483_s4 }
  0x60   : > { %1250 = vmatpush1.bf16.xpose.msra.mxu0 %v1249_v12  ;;  %1188 = vmatprep.subr.bf16.mxu1 %v1187_v16  ;;  %v421_v23 = vld [vmem:[#allocation6 + $0xa8] sm:$0xff]  ;;  %v419_v24 = vld [vmem:[#allocation6 + $0x98] sm:$0xff]  ;;  %v1189_v26 = vpack.c.bf16 %v412_v19, %v408_v18  ;;  %v1253_v27 = vpack.c.bf16 %v414_v21, %v410_v20  ;;  %v416_v30 = vld [vmem:[#allocation6 + $0x80] sm:$0xff]  ;;  %p1480_p6 = pnand %p1479_p4, %p1692_p10  ;;  %p1486_p11 = scmp.lt.s32.totalorder %s1484_s6, %s1478_s26 }
  0x61   : > { %1252 = vmatprep.subr.bf16.mxu0 %v1251_v17  ;;  %v423_v25 = vld [vmem:[#allocation6 + $0xb8] sm:$0xff]  ;;  %v1191_v28 = vpack.c.bf16 %v421_v23, %v417_v22  ;;  %v420_v31 = vld [vmem:[#allocation6 + $0xa0] sm:$0xff]  ;;  %v418_v32 = vld [vmem:[#allocation6 + $0x90] sm:$0xff] }
  0x62   : > { %v1255_v29 = vpack.c.bf16 %v423_v25, %v419_v24  ;;  %v422_v33 = vld [vmem:[#allocation6 + $0xb0] sm:$0xff]  ;;  %v425_v34 = vld [vmem:[#allocation6 + $0xc8] sm:$0xff]  ;;  %v427_v36 = vld [vmem:[#allocation6 + $0xd8] sm:$0xff]  ;;  %v1193_v38 = vpack.c.bf16 %v420_v31, %v416_v30  ;;  %p1481_p8 = pneg %p1480_p6  ;;  %p1487_p0 = por %p1486_p11, %p1485_p12 }
  0x63   : > { %v429_v35 = vld [vmem:[#allocation6 + $0xe8] sm:$0xff]  ;;  %v431_v37 = vld [vmem:[#allocation6 + $0xf8] sm:$0xff]  ;;  %v1257_v39 = vpack.c.bf16 %v422_v33, %v418_v32  ;;  %v424_v42 = vld [vmem:[#allocation6 + $0xc0] sm:$0xff] }
  0x64   : > { %v1195_v40 = vpack.c.bf16 %v429_v35, %v425_v34  ;;  %v1259_v41 = vpack.c.bf16 %v431_v37, %v427_v36  ;;  %v428_v43 = vld [vmem:[#allocation6 + $0xe0] sm:$0xff]  ;;  %v426_v44 = vld [vmem:[#allocation6 + $0xd0] sm:$0xff]  ;;  %v433_v46 = vld [vmem:[#allocation6 + $0x108] sm:$0xff]  ;;  %p1488_p5 = pnand %p1487_p0, %p1481_p8 }
  0x65   : > { %v430_v45 = vld [vmem:[#allocation6 + $0xf0] sm:$0xff]  ;;  %v437_v47 = vld [vmem:[#allocation6 + $0x128] sm:$0xff]  ;;  %v435_v48 = vld [vmem:[#allocation6 + $0x118] sm:$0xff]  ;;  %v1197_v50 = vpack.c.bf16 %v428_v43, %v424_v42 }
  0x66   : > { %v439_v49 = vld [vmem:[#allocation6 + $0x138] sm:$0xff]  ;;  %v1261_v51 = vpack.c.bf16 %v430_v45, %v426_v44  ;;  %v1199_v52 = vpack.c.bf16 %v437_v47, %v433_v46  ;;  %v432_v54 = vld [vmem:[#allocation6 + $0x100] sm:$0xff]  ;;  %v434_v56 = vld [vmem:[#allocation6 + $0x110] sm:$0xff] }
  0x67   : > { %1190 = vmatpush1.bf16.xpose.msra.mxu1 %v1189_v26  ;;  %v1263_v53 = vpack.c.bf16 %v439_v49, %v435_v48  ;;  %v436_v55 = vld [vmem:[#allocation6 + $0x120] sm:$0xff]  ;;  %v438_v57 = vld [vmem:[#allocation6 + $0x130] sm:$0xff]  ;;  %v441_v58 = vld [vmem:[#allocation6 + $0x148] sm:$0xff] }
  0x68   : > { %1254 = vmatpush1.bf16.xpose.msra.mxu0 %v1253_v27  ;;  %1192 = vmatprep.subr.bf16.mxu1 %v1191_v28  ;;  %v445_v59 = vld [vmem:[#allocation6 + $0x168] sm:$0xff]  ;;  %v443_v60 = vld [vmem:[#allocation6 + $0x158] sm:$0xff]  ;;  %v1201_v62 = vpack.c.bf16 %v436_v55, %v432_v54  ;;  %v1265_v63 = vpack.c.bf16 %v438_v57, %v434_v56  ;;  %v440_v2 = vld [vmem:[#allocation6 + $0x140] sm:$0xff] }
  0x69   : > { %1256 = vmatprep.subr.bf16.mxu0 %v1255_v29  ;;  %v447_v61 = vld [vmem:[#allocation6 + $0x178] sm:$0xff]  ;;  %v1203_v0 = vpack.c.bf16 %v445_v59, %v441_v58  ;;  %v444_v3 = vld [vmem:[#allocation6 + $0x160] sm:$0xff]  ;;  %v442_v4 = vld [vmem:[#allocation6 + $0x150] sm:$0xff] }
  0x6a   : > { %v1267_v1 = vpack.c.bf16 %v447_v61, %v443_v60  ;;  %v446_v5 = vld [vmem:[#allocation6 + $0x170] sm:$0xff]  ;;  %v449_v6 = vld [vmem:[#allocation6 + $0x188] sm:$0xff]  ;;  %v451_v8 = vld [vmem:[#allocation6 + $0x198] sm:$0xff]  ;;  %v1205_v10 = vpack.c.bf16 %v444_v3, %v440_v2 }
  0x6b   : > { %v453_v7 = vld [vmem:[#allocation6 + $0x1a8] sm:$0xff]  ;;  %v455_v9 = vld [vmem:[#allocation6 + $0x1b8] sm:$0xff]  ;;  %v1269_v11 = vpack.c.bf16 %v446_v5, %v442_v4  ;;  %v448_v16 = vld [vmem:[#allocation6 + $0x180] sm:$0xff] }
  0x6c   : > { %v1207_v12 = vpack.c.bf16 %v453_v7, %v449_v6  ;;  %v1271_v13 = vpack.c.bf16 %v455_v9, %v451_v8  ;;  %v337_v14 = vld [vmem:[%s1755_s8 + $0x8] sm:$0xff]  ;;  %v339_v15 = vld [vmem:[%s1755_s8 + $0x18] sm:$0xff]  ;;  %v452_v17 = vld [vmem:[#allocation6 + $0x1a0] sm:$0xff] }
  0x6d   : > { %592 = vmatprep.mubr.f32.mxu1 %v337_v14  ;;  %753 = vmatprep.mubr.f32.mxu0 %v339_v15  ;;  %v450_v18 = vld [vmem:[#allocation6 + $0x190] sm:$0xff]  ;;  %v457_v20 = vld [vmem:[#allocation6 + $0x1c8] sm:$0xff]  ;;  %v459_v22 = vld [vmem:[#allocation6 + $0x1d8] sm:$0xff]  ;;  %v1209_v24 = vpack.c.bf16 %v452_v17, %v448_v16 }
  0x6e   : > { %v454_v19 = vld [vmem:[#allocation6 + $0x1b0] sm:$0xff]  ;;  %v461_v21 = vld [vmem:[#allocation6 + $0x1e8] sm:$0xff]  ;;  %v463_v23 = vld [vmem:[#allocation6 + $0x1f8] sm:$0xff] }
  0x6f   : > { %1194 = vmatpush1.bf16.xpose.msra.mxu1 %v1193_v38  ;;  %v1273_v25 = vpack.c.bf16 %v454_v19, %v450_v18  ;;  %v1211_v26 = vpack.c.bf16 %v461_v21, %v457_v20  ;;  %v1275_v27 = vpack.c.bf16 %v463_v23, %v459_v22  ;;  %v456_v28 = vld [vmem:[#allocation6 + $0x1c0] sm:$0xff]  ;;  %v458_v30 = vld [vmem:[#allocation6 + $0x1d0] sm:$0xff]  ;;  %v465_v32 = vld [vmem:[#allocation6 + $0x208] sm:$0xff] }
  0x70   : > { %1258 = vmatpush1.bf16.xpose.msra.mxu0 %v1257_v39  ;;  %1196 = vmatprep.subr.bf16.mxu1 %v1195_v40  ;;  %v460_v29 = vld [vmem:[#allocation6 + $0x1e0] sm:$0xff]  ;;  %v462_v31 = vld [vmem:[#allocation6 + $0x1f0] sm:$0xff]  ;;  %v469_v33 = vld [vmem:[#allocation6 + $0x228] sm:$0xff] }
  0x71   : > { %1260 = vmatprep.subr.bf16.mxu0 %v1259_v41  ;;  %v467_v34 = vld [vmem:[#allocation6 + $0x218] sm:$0xff]  ;;  %v1213_v36 = vpack.c.bf16 %v460_v29, %v456_v28  ;;  %v1277_v37 = vpack.c.bf16 %v462_v31, %v458_v30  ;;  %v1215_v38 = vpack.c.bf16 %v469_v33, %v465_v32  ;;  %v464_v40 = vld [vmem:[#allocation6 + $0x200] sm:$0xff]  ;;  %v466_v42 = vld [vmem:[#allocation6 + $0x210] sm:$0xff] }
  0x72   : > { %v471_v35 = vld [vmem:[#allocation6 + $0x238] sm:$0xff]  ;;  %v468_v41 = vld [vmem:[#allocation6 + $0x220] sm:$0xff]  ;;  %v470_v43 = vld [vmem:[#allocation6 + $0x230] sm:$0xff] }
  0x73   : > { %v1279_v39 = vpack.c.bf16 %v471_v35, %v467_v34  ;;  %v473_v44 = vld [vmem:[#allocation6 + $0x248] sm:$0xff]  ;;  %v475_v46 = vld [vmem:[#allocation6 + $0x258] sm:$0xff]  ;;  %v1217_v48 = vpack.c.bf16 %v468_v41, %v464_v40  ;;  %v1281_v49 = vpack.c.bf16 %v470_v43, %v466_v42  ;;  %v474_v54 = vld [vmem:[#allocation6 + $0x250] sm:$0xff] }
  0x74   : > { %v477_v45 = vld [vmem:[#allocation6 + $0x268] sm:$0xff]  ;;  %v479_v47 = vld [vmem:[#allocation6 + $0x278] sm:$0xff]  ;;  %v478_v55 = vld [vmem:[#allocation6 + $0x270] sm:$0xff] }
  0x75   : > { %v481_v56 = vld [vmem:[#allocation6 + $0x288] sm:$0xff]  ;;  %v483_v58 = vld [vmem:[#allocation6 + $0x298] sm:$0xff]  ;;  %v1285_v61 = vpack.c.bf16 %v478_v55, %v474_v54  ;;  %v482_v2 = vld [vmem:[#allocation6 + $0x290] sm:$0xff] }
  0x76   : > { %v485_v57 = vld [vmem:[#allocation6 + $0x2a8] sm:$0xff]  ;;  %v487_v59 = vld [vmem:[#allocation6 + $0x2b8] sm:$0xff]  ;;  %v486_v3 = vld [vmem:[#allocation6 + $0x2b0] sm:$0xff] }
  0x77   : > { %1198 = vmatpush1.bf16.xpose.msra.mxu1 %v1197_v50  ;;  %v1219_v50 = vpack.c.bf16 %v477_v45, %v473_v44  ;;  %v489_v4 = vld [vmem:[#allocation6 + $0x2c8] sm:$0xff]  ;;  %v491_v6 = vld [vmem:[#allocation6 + $0x2d8] sm:$0xff]  ;;  %v1289_v9 = vpack.c.bf16 %v486_v3, %v482_v2  ;;  %v490_v14 = vld [vmem:[#allocation6 + $0x2d0] sm:$0xff] }
  0x78   : > { %1262 = vmatpush1.bf16.xpose.msra.mxu0 %v1261_v51  ;;  %1200 = vmatprep.subr.bf16.mxu1 %v1199_v52  ;;  %v1283_v51 = vpack.c.bf16 %v479_v47, %v475_v46  ;;  %v472_v52 = vld [vmem:[#allocation6 + $0x240] sm:$0xff]  ;;  %v493_v5 = vld [vmem:[#allocation6 + $0x2e8] sm:$0xff]  ;;  %v495_v7 = vld [vmem:[#allocation6 + $0x2f8] sm:$0xff] }
  0x79   : > { %1264 = vmatprep.subr.bf16.mxu0 %v1263_v53  ;;  %v476_v53 = vld [vmem:[#allocation6 + $0x260] sm:$0xff]  ;;  %v494_v15 = vld [vmem:[#allocation6 + $0x2f0] sm:$0xff]  ;;  %v497_v16 = vld [vmem:[#allocation6 + $0x308] sm:$0xff] }
  0x7a   : > { %v1221_v60 = vpack.c.bf16 %v476_v53, %v472_v52  ;;  %v501_v17 = vld [vmem:[#allocation6 + $0x328] sm:$0xff]  ;;  %v499_v18 = vld [vmem:[#allocation6 + $0x318] sm:$0xff]  ;;  %v1293_v21 = vpack.c.bf16 %v494_v15, %v490_v14  ;;  %v336_v2 = vld [vmem:[%s1755_s8] sm:$0xff] }
  0x7b   : > { %v503_v19 = vld [vmem:[#allocation6 + $0x338] sm:$0xff]  ;;  %v1231_v22 = vpack.c.bf16 %v501_v17, %v497_v16  ;;  %v505_v28 = vld [vmem:[#allocation6 + $0x348] sm:$0xff]  ;;  %v338_v3 = vld [vmem:[%s1755_s8 + $0x10] sm:$0xff] }
  0x7c   : > { %v1295_v23 = vpack.c.bf16 %v503_v19, %v499_v18  ;;  %v509_v29 = vld [vmem:[#allocation6 + $0x368] sm:$0xff]  ;;  %v507_v30 = vld [vmem:[#allocation6 + $0x358] sm:$0xff]  ;;  %v348_v14 = vld [vmem:[%s1755_s8 + $0x60] sm:$0xff] }
  0x7d   : > { %v511_v31 = vld [vmem:[#allocation6 + $0x378] sm:$0xff]  ;;  %v1235_v34 = vpack.c.bf16 %v509_v29, %v505_v28  ;;  %v513_v40 = vld [vmem:[#allocation6 + $0x388] sm:$0xff]  ;;  %v350_v15 = vld [vmem:[%s1755_s8 + $0x70] sm:$0xff] }
  0x7e   : > { %v1299_v35 = vpack.c.bf16 %v511_v31, %v507_v30  ;;  %v517_v41 = vld [vmem:[#allocation6 + $0x3a8] sm:$0xff]  ;;  %v515_v42 = vld [vmem:[#allocation6 + $0x398] sm:$0xff]  ;;  %v352_v18 = vld [vmem:[%s1755_s8 + $0x80] sm:$0xff] }
  0x7f   : > { %1202 = vmatpush1.bf16.xpose.msra.mxu1 %v1201_v62  ;;  %v1223_v62 = vpack.c.bf16 %v485_v57, %v481_v56  ;;  %v519_v43 = vld [vmem:[#allocation6 + $0x3b8] sm:$0xff]  ;;  %v1239_v46 = vpack.c.bf16 %v517_v41, %v513_v40  ;;  %v521_v52 = vld [vmem:[#allocation6 + $0x3c8] sm:$0xff]  ;;  %v354_v19 = vld [vmem:[%s1755_s8 + $0x90] sm:$0xff] }
  0x80   : > { %1266 = vmatpush1.bf16.xpose.msra.mxu0 %v1265_v63  ;;  %1204 = vmatprep.subr.bf16.mxu1 %v1203_v0  ;;  %v1287_v63 = vpack.c.bf16 %v487_v59, %v483_v58  ;;  %v480_v0 = vld [vmem:[#allocation6 + $0x280] sm:$0xff]  ;;  %v1303_v47 = vpack.c.bf16 %v519_v43, %v515_v42  ;;  %v525_v53 = vld [vmem:[#allocation6 + $0x3e8] sm:$0xff]  ;;  %v523_v54 = vld [vmem:[#allocation6 + $0x3d8] sm:$0xff] }
  0x81   : > { %1268 = vmatprep.subr.bf16.mxu0 %v1267_v1  ;;  %v484_v1 = vld [vmem:[#allocation6 + $0x2a0] sm:$0xff]  ;;  %v527_v55 = vld [vmem:[#allocation6 + $0x3f8] sm:$0xff]  ;;  %v1243_v58 = vpack.c.bf16 %v525_v53, %v521_v52  ;;  %v353_v16 = vld [vmem:[%s1755_s8 + $0x88] sm:$0xff] }
  0x82   : > { %v1225_v8 = vpack.c.bf16 %v484_v1, %v480_v0  ;;  %v1307_v59 = vpack.c.bf16 %v527_v55, %v523_v54  ;;  %v355_v17 = vld [vmem:[%s1755_s8 + $0x98] sm:$0xff]  ;;  %v365_v28 = vld [vmem:[%s1755_s8 + $0xe8] sm:$0xff]  ;;  %v364_v30 = vld [vmem:[%s1755_s8 + $0xe0] sm:$0xff] }
  0x83   : > { %v367_v29 = vld [vmem:[%s1755_s8 + $0xf8] sm:$0xff]  ;;  %v366_v31 = vld [vmem:[%s1755_s8 + $0xf0] sm:$0xff]  ;;  %v377_v40 = vld [vmem:[%s1755_s8 + $0x148] sm:$0xff] }
  0x84   : > { %v379_v41 = vld [vmem:[%s1755_s8 + $0x158] sm:$0xff]  ;;  %v376_v42 = vld [vmem:[%s1755_s8 + $0x140] sm:$0xff]  ;;  %v378_v43 = vld [vmem:[%s1755_s8 + $0x150] sm:$0xff] }
  0x85   : > { %v389_v52 = vld [vmem:[%s1755_s8 + $0x1a8] sm:$0xff]  ;;  %v391_v53 = vld [vmem:[%s1755_s8 + $0x1b8] sm:$0xff]  ;;  %v388_v54 = vld [vmem:[%s1755_s8 + $0x1a0] sm:$0xff] }
  0x86   : > { %v390_v55 = vld [vmem:[%s1755_s8 + $0x1b0] sm:$0xff] }
  0x87   : > { %1206 = vmatpush1.bf16.xpose.msra.mxu1 %v1205_v10  ;;  %v1227_v10 = vpack.c.bf16 %v493_v5, %v489_v4  ;;  %v341_v4 = vld [vmem:[%s1755_s8 + $0x28] sm:$0xff]  ;;  %v343_v5 = vld [vmem:[%s1755_s8 + $0x38] sm:$0xff] }
  0x88   : > { %1270 = vmatpush1.bf16.xpose.msra.mxu0 %v1269_v11  ;;  %1208 = vmatprep.subr.bf16.mxu1 %v1207_v12  ;;  %v1291_v11 = vpack.c.bf16 %v495_v7, %v491_v6  ;;  %v488_v12 = vld [vmem:[#allocation6 + $0x2c0] sm:$0xff]  ;;  %v342_v7 = vld [vmem:[%s1755_s8 + $0x30] sm:$0xff] }
  0x89   : > { %1272 = vmatprep.subr.bf16.mxu0 %v1271_v13  ;;  %v492_v13 = vld [vmem:[#allocation6 + $0x2e0] sm:$0xff] }
  0x8a   : > { %v1229_v20 = vpack.c.bf16 %v492_v13, %v488_v12  ;;  %v340_v6 = vld [vmem:[%s1755_s8 + $0x20] sm:$0xff]  ;;  %v349_v12 = vld [vmem:[%s1755_s8 + $0x68] sm:$0xff]  ;;  %v351_v13 = vld [vmem:[%s1755_s8 + $0x78] sm:$0xff] }
  0x8f   : > { %1210 = vmatpush1.bf16.xpose.msra.mxu1 %v1209_v24  ;;  %v496_v24 = vld [vmem:[#allocation6 + $0x300] sm:$0xff] }
  0x90   : > { %1274 = vmatpush1.bf16.xpose.msra.mxu0 %v1273_v25  ;;  %1212 = vmatprep.subr.bf16.mxu1 %v1211_v26  ;;  %v500_v25 = vld [vmem:[#allocation6 + $0x320] sm:$0xff]  ;;  %v498_v26 = vld [vmem:[#allocation6 + $0x310] sm:$0xff] }
  0x91   : > { %1276 = vmatprep.subr.bf16.mxu0 %v1275_v27  ;;  %v502_v27 = vld [vmem:[#allocation6 + $0x330] sm:$0xff]  ;;  %v1233_v32 = vpack.c.bf16 %v500_v25, %v496_v24  ;;  %v361_v24 = vld [vmem:[%s1755_s8 + $0xc8] sm:$0xff]  ;;  %v363_v25 = vld [vmem:[%s1755_s8 + $0xd8] sm:$0xff] }
  0x92   : > { %v1297_v33 = vpack.c.bf16 %v502_v27, %v498_v26  ;;  %v360_v26 = vld [vmem:[%s1755_s8 + $0xc0] sm:$0xff]  ;;  %v362_v27 = vld [vmem:[%s1755_s8 + $0xd0] sm:$0xff] }
  0x97   : > { %1214 = vmatpush1.bf16.xpose.msra.mxu1 %v1213_v36  ;;  %v504_v36 = vld [vmem:[#allocation6 + $0x340] sm:$0xff] }
  0x98   : > { %1278 = vmatpush1.bf16.xpose.msra.mxu0 %v1277_v37  ;;  %1216 = vmatprep.subr.bf16.mxu1 %v1215_v38  ;;  %v508_v37 = vld [vmem:[#allocation6 + $0x360] sm:$0xff]  ;;  %v506_v38 = vld [vmem:[#allocation6 + $0x350] sm:$0xff] }
  0x99   : > { %1280 = vmatprep.subr.bf16.mxu0 %v1279_v39  ;;  %v510_v39 = vld [vmem:[#allocation6 + $0x370] sm:$0xff]  ;;  %v1237_v44 = vpack.c.bf16 %v508_v37, %v504_v36  ;;  %v373_v36 = vld [vmem:[%s1755_s8 + $0x128] sm:$0xff]  ;;  %v375_v37 = vld [vmem:[%s1755_s8 + $0x138] sm:$0xff] }
  0x9a   : > { %v1301_v45 = vpack.c.bf16 %v510_v39, %v506_v38  ;;  %v372_v38 = vld [vmem:[%s1755_s8 + $0x120] sm:$0xff]  ;;  %v374_v39 = vld [vmem:[%s1755_s8 + $0x130] sm:$0xff] }
  0x9f   : > { %1218 = vmatpush1.bf16.xpose.msra.mxu1 %v1217_v48  ;;  %v512_v48 = vld [vmem:[#allocation6 + $0x380] sm:$0xff] }
  0xa0   : > { %1282 = vmatpush1.bf16.xpose.msra.mxu0 %v1281_v49  ;;  %1220 = vmatprep.subr.bf16.mxu1 %v1219_v50  ;;  %v516_v49 = vld [vmem:[#allocation6 + $0x3a0] sm:$0xff]  ;;  %v514_v50 = vld [vmem:[#allocation6 + $0x390] sm:$0xff] }
  0xa1   : > { %1284 = vmatprep.subr.bf16.mxu0 %v1283_v51  ;;  %v518_v51 = vld [vmem:[#allocation6 + $0x3b0] sm:$0xff]  ;;  %v1241_v56 = vpack.c.bf16 %v516_v49, %v512_v48  ;;  %v385_v48 = vld [vmem:[%s1755_s8 + $0x188] sm:$0xff]  ;;  %v387_v49 = vld [vmem:[%s1755_s8 + $0x198] sm:$0xff] }
  0xa2   : > { %v1305_v57 = vpack.c.bf16 %v518_v51, %v514_v50  ;;  %v384_v50 = vld [vmem:[%s1755_s8 + $0x180] sm:$0xff]  ;;  %v386_v51 = vld [vmem:[%s1755_s8 + $0x190] sm:$0xff] }
  0xa7   : > { %1222 = vmatpush1.bf16.xpose.msra.mxu1 %v1221_v60  ;;  %v520_v60 = vld [vmem:[#allocation6 + $0x3c0] sm:$0xff] }
  0xa8   : > { %1286 = vmatpush1.bf16.xpose.msra.mxu0 %v1285_v61  ;;  %1224 = vmatprep.subr.bf16.mxu1 %v1223_v62  ;;  %v524_v61 = vld [vmem:[#allocation6 + $0x3e0] sm:$0xff]  ;;  %v522_v62 = vld [vmem:[#allocation6 + $0x3d0] sm:$0xff] }
  0xa9   : > { %1288 = vmatprep.subr.bf16.mxu0 %v1287_v63  ;;  %v526_v63 = vld [vmem:[#allocation6 + $0x3f0] sm:$0xff]  ;;  %v1245_v0 = vpack.c.bf16 %v524_v61, %v520_v60  ;;  %v397_v60 = vld [vmem:[%s1755_s8 + $0x1e8] sm:$0xff]  ;;  %v399_v61 = vld [vmem:[%s1755_s8 + $0x1f8] sm:$0xff] }
  0xaa   : > { %v1309_v1 = vpack.c.bf16 %v526_v63, %v522_v62  ;;  %v396_v62 = vld [vmem:[%s1755_s8 + $0x1e0] sm:$0xff]  ;;  %v398_v63 = vld [vmem:[%s1755_s8 + $0x1f0] sm:$0xff] }
  0xaf   : > { %1226 = vmatpush1.bf16.xpose.msra.mxu1 %v1225_v8  ;;  %v345_v8 = vld [vmem:[%s1755_s8 + $0x48] sm:$0xff] }
  0xb0   : > { %1290 = vmatpush1.bf16.xpose.msra.mxu0 %v1289_v9  ;;  %1228 = vmatprep.subr.bf16.mxu1 %v1227_v10  ;;  %v347_v9 = vld [vmem:[%s1755_s8 + $0x58] sm:$0xff]  ;;  %v344_v10 = vld [vmem:[%s1755_s8 + $0x40] sm:$0xff] }
  0xb1   : > { %1292 = vmatprep.subr.bf16.mxu0 %v1291_v11  ;;  %v346_v11 = vld [vmem:[%s1755_s8 + $0x50] sm:$0xff] }
  0xb7   : > { %1230 = vmatpush1.bf16.xpose.msra.mxu1 %v1229_v20  ;;  %v357_v20 = vld [vmem:[%s1755_s8 + $0xa8] sm:$0xff] }
  0xb8   : > { %1294 = vmatpush1.bf16.xpose.msra.mxu0 %v1293_v21  ;;  %1232 = vmatprep.subr.bf16.mxu1 %v1231_v22  ;;  %v359_v21 = vld [vmem:[%s1755_s8 + $0xb8] sm:$0xff]  ;;  %v356_v22 = vld [vmem:[%s1755_s8 + $0xa0] sm:$0xff] }
  0xb9   : > { %1296 = vmatprep.subr.bf16.mxu0 %v1295_v23  ;;  %v358_v23 = vld [vmem:[%s1755_s8 + $0xb0] sm:$0xff] }
  0xbf   : > { %1234 = vmatpush1.bf16.xpose.msra.mxu1 %v1233_v32  ;;  %v369_v32 = vld [vmem:[%s1755_s8 + $0x108] sm:$0xff] }
  0xc0   : > { %1298 = vmatpush1.bf16.xpose.msra.mxu0 %v1297_v33  ;;  %1236 = vmatprep.subr.bf16.mxu1 %v1235_v34  ;;  %v371_v33 = vld [vmem:[%s1755_s8 + $0x118] sm:$0xff]  ;;  %v368_v34 = vld [vmem:[%s1755_s8 + $0x100] sm:$0xff] }
  0xc1   : > { %1300 = vmatprep.subr.bf16.mxu0 %v1299_v35  ;;  %v370_v35 = vld [vmem:[%s1755_s8 + $0x110] sm:$0xff] }
  0xc7   : > { %1238 = vmatpush1.bf16.xpose.msra.mxu1 %v1237_v44  ;;  %v381_v44 = vld [vmem:[%s1755_s8 + $0x168] sm:$0xff] }
  0xc8   : > { %1302 = vmatpush1.bf16.xpose.msra.mxu0 %v1301_v45  ;;  %1240 = vmatprep.subr.bf16.mxu1 %v1239_v46  ;;  %v383_v45 = vld [vmem:[%s1755_s8 + $0x178] sm:$0xff]  ;;  %v380_v46 = vld [vmem:[%s1755_s8 + $0x160] sm:$0xff] }
  0xc9   : > { %1304 = vmatprep.subr.bf16.mxu0 %v1303_v47  ;;  %v382_v47 = vld [vmem:[%s1755_s8 + $0x170] sm:$0xff] }
  0xcf   : > { %1242 = vmatpush1.bf16.xpose.msra.mxu1 %v1241_v56  ;;  %v393_v56 = vld [vmem:[%s1755_s8 + $0x1c8] sm:$0xff] }
  0xd0   : > { %1306 = vmatpush1.bf16.xpose.msra.mxu0 %v1305_v57  ;;  %1244 = vmatprep.subr.bf16.mxu1 %v1243_v58  ;;  %v395_v57 = vld [vmem:[%s1755_s8 + $0x1d8] sm:$0xff]  ;;  %v392_v58 = vld [vmem:[%s1755_s8 + $0x1c0] sm:$0xff] }
  0xd1   : > { %1308 = vmatprep.subr.bf16.mxu0 %v1307_v59  ;;  %v394_v59 = vld [vmem:[%s1755_s8 + $0x1d0] sm:$0xff] }
  0xd7   : > { %1246 = vmatpush1.bf16.xpose.msra.mxu1 %v1245_v0  ;;  %v951_v0 = vlaneseq }
  0xd8   : > { %1310 = vmatpush1.bf16.xpose.msra.mxu0 %v1309_v1 }
  0xd9   : > { %v952_v1 = vshrl.u32 %v951_v0, 7 }
  0xde   : > { %593 = vmatmul.mubr.f32.vlgmr.msra.gmra.mrb[0].mxu1 %v336_v2  ;;  %v953_v2 = vsub.s32 0, %v952_v1 }
  0xdf   : > { %754 = vmatmul.mubr.f32.vlgmr.msra.gmra.mrb[0].mxu0 %v338_v3  ;;  %598 = vmatprep.mubr.f32.mxu1 %v341_v4  ;;  %v949_v3 = vld [vmem:[%s1961_s2] sm:$0x3]  ;;  %v957_v4 = vsub.s32 1, %v952_v1 }
  0xe0   : > { %759 = vmatprep.mubr.f32.mxu0 %v343_v5 }
  0xe2   : > { %599 = vmatmul.mubr.f32.gmra.mrb[2].mxu1 %v340_v6  ;;  %v1833_v6 = vrot.slane %v949_v3, %v953_v2 }
  0xe3   : > { %760 = vmatmul.mubr.f32.gmra.mrb[2].mxu0 %v342_v7  ;;  %604 = vmatprep.mubr.f32.mxu1 %v345_v8 }
  0xe4   : > { %765 = vmatprep.mubr.f32.mxu0 %v347_v9  ;;  %v1835_v9 = vrot.slane %v949_v3, %v957_v4 }
  0xe6   : > { %605 = vmatmul.mubr.f32.gmra.mrb[4].mxu1 %v344_v10 }
  0xe7   : > { %766 = vmatmul.mubr.f32.gmra.mrb[4].mxu0 %v346_v11  ;;  %610 = vmatprep.mubr.f32.mxu1 %v349_v12 }
  0xe8   : > { %771 = vmatprep.mubr.f32.mxu0 %v351_v13 }
  0xea   : > { %611 = vmatmul.mubr.f32.gmra.mrb[6].mxu1 %v348_v14 }
  0xeb   : > { %772 = vmatmul.mubr.f32.gmra.mrb[6].mxu0 %v350_v15  ;;  %616 = vmatprep.mubr.f32.mxu1 %v353_v16 }
  0xec   : > { %777 = vmatprep.mubr.f32.mxu0 %v355_v17 }
  0xee   : > { %617 = vmatmul.mubr.f32.gmra.mrb[8].mxu1 %v352_v18 }
  0xef   : > { %778 = vmatmul.mubr.f32.gmra.mrb[8].mxu0 %v354_v19  ;;  %622 = vmatprep.mubr.f32.mxu1 %v357_v20 }
  0xf0   : > { %783 = vmatprep.mubr.f32.mxu0 %v359_v21 }
  0xf2   : > { %623 = vmatmul.mubr.f32.gmra.mrb[10].mxu1 %v356_v22 }
  0xf3   : > { %784 = vmatmul.mubr.f32.gmra.mrb[10].mxu0 %v358_v23  ;;  %628 = vmatprep.mubr.f32.mxu1 %v361_v24 }
  0xf4   : > { %789 = vmatprep.mubr.f32.mxu0 %v363_v25 }
  0xf6   : > { %629 = vmatmul.mubr.f32.gmra.mrb[12].mxu1 %v360_v26 }
  0xf7   : > { %790 = vmatmul.mubr.f32.gmra.mrb[12].mxu0 %v362_v27  ;;  %634 = vmatprep.mubr.f32.mxu1 %v365_v28 }
  0xf8   : > { %795 = vmatprep.mubr.f32.mxu0 %v367_v29 }
  0xfa   : > { %635 = vmatmul.mubr.f32.gmra.mrb[14].mxu1 %v364_v30 }
  0xfb   : > { %796 = vmatmul.mubr.f32.gmra.mrb[14].mxu0 %v366_v31  ;;  %640 = vmatprep.mubr.f32.mxu1 %v369_v32 }
  0xfc   : > { %801 = vmatprep.mubr.f32.mxu0 %v371_v33 }
  0xfe   : > { %641 = vmatmul.mubr.f32.gmra.mrb[16].mxu1 %v368_v34 }
  0xff   : > { %802 = vmatmul.mubr.f32.gmra.mrb[16].mxu0 %v370_v35  ;;  %646 = vmatprep.mubr.f32.mxu1 %v373_v36 }
 0x100   : > { %807 = vmatprep.mubr.f32.mxu0 %v375_v37 }
 0x102   : > { %647 = vmatmul.mubr.f32.gmra.mrb[18].mxu1 %v372_v38 }
 0x103   : > { %808 = vmatmul.mubr.f32.gmra.mrb[18].mxu0 %v374_v39  ;;  %652 = vmatprep.mubr.f32.mxu1 %v377_v40 }
 0x104   : > { %813 = vmatprep.mubr.f32.mxu0 %v379_v41 }
 0x106   : > { %653 = vmatmul.mubr.f32.gmra.mrb[20].mxu1 %v376_v42 }
 0x107   : > { %814 = vmatmul.mubr.f32.gmra.mrb[20].mxu0 %v378_v43  ;;  %658 = vmatprep.mubr.f32.mxu1 %v381_v44 }
 0x108   : > { %819 = vmatprep.mubr.f32.mxu0 %v383_v45 }
 0x10a   : > { %659 = vmatmul.mubr.f32.gmra.mrb[22].mxu1 %v380_v46 }
 0x10b   : > { %820 = vmatmul.mubr.f32.gmra.mrb[22].mxu0 %v382_v47  ;;  %664 = vmatprep.mubr.f32.mxu1 %v385_v48 }
 0x10c   : > { %825 = vmatprep.mubr.f32.mxu0 %v387_v49 }
 0x10e   : > { %665 = vmatmul.mubr.f32.gmra.mrb[24].mxu1 %v384_v50 }
 0x10f   : > { %826 = vmatmul.mubr.f32.gmra.mrb[24].mxu0 %v386_v51  ;;  %670 = vmatprep.mubr.f32.mxu1 %v389_v52 }
 0x110   : > { %831 = vmatprep.mubr.f32.mxu0 %v391_v53 }
 0x112   : > { %671 = vmatmul.mubr.f32.gmra.mrb[26].mxu1 %v388_v54 }
 0x113   : > { %832 = vmatmul.mubr.f32.gmra.mrb[26].mxu0 %v390_v55  ;;  %676 = vmatprep.mubr.f32.mxu1 %v393_v56 }
 0x114   : > { %837 = vmatprep.mubr.f32.mxu0 %v395_v57 }
 0x116   : > { %677 = vmatmul.mubr.f32.gmra.mrb[28].mxu1 %v392_v58 }
 0x117   : > { %838 = vmatmul.mubr.f32.gmra.mrb[28].mxu0 %v394_v59  ;;  %682 = vmatprep.mubr.f32.mxu1 %v397_v60 }
 0x118   : > { %843 = vmatprep.mubr.f32.mxu0 %v399_v61 }
 0x11a   : > { %683 = vmatmul.mubr.f32.gmra.mrb[30].mxu1 %v396_v62 }
 0x11b   : > { %844 = vmatmul.mubr.f32.gmra.mrb[30].mxu0 %v398_v63 }
 0x1b1   : > { %v594_v5 = vpop.f32.mrb[0].mxu1 }
 0x1b2   : > { %v755_v7 = vpop.f32.mrb[0].mxu0  ;;  %v596_v8 = vpop.f32.mrb[1].mxu1 }
 0x1b3   : > { %v756_v10 = vadd.f32 %v755_v7, %v594_v5  ;;  %v757_v11 = vpop.f32.mrb[1].mxu0 }
 0x1b4   : > { %v758_v12 = vadd.f32 %v757_v11, %v596_v8 }
 0x1b5   : > { %v961_v13 = vadd.f32 %v1833_v6, %v756_v10  ;;  %v600_v14 = vpop.f32.mrb[2].mxu1 }
 0x1b6   : > { %v962_v15 = vadd.f32 %v1835_v9, %v758_v12  ;;  %v761_v16 = vpop.f32.mrb[2].mxu0  ;;  %v602_v17 = vpop.f32.mrb[3].mxu1 }
 0x1b7   : > { %993 = vst [vmem:[%s1839_s10] sm:$0xff] %v961_v13  ;;  %v762_v18 = vadd.f32 %v761_v16, %v600_v14  ;;  %v763_v19 = vpop.f32.mrb[3].mxu0 }
 0x1b8   : > { %994 = vst [vmem:[%s1839_s10 + $0x8] sm:$0xff] %v962_v15  ;;  %v764_v20 = vadd.f32 %v763_v19, %v602_v17 }
 0x1b9   : > { %v963_v21 = vadd.f32 %v1833_v6, %v762_v18  ;;  %v606_v22 = vpop.f32.mrb[4].mxu1 }
 0x1ba   : > { %v964_v23 = vadd.f32 %v1835_v9, %v764_v20  ;;  %v767_v24 = vpop.f32.mrb[4].mxu0  ;;  %v608_v25 = vpop.f32.mrb[5].mxu1 }
 0x1bb   : > { %995 = vst [vmem:[%s1839_s10 + $0x10] sm:$0xff] %v963_v21  ;;  %v768_v26 = vadd.f32 %v767_v24, %v606_v22  ;;  %v769_v27 = vpop.f32.mrb[5].mxu0 }
 0x1bc   : > { %996 = vst [vmem:[%s1839_s10 + $0x18] sm:$0xff] %v964_v23  ;;  %v770_v28 = vadd.f32 %v769_v27, %v608_v25 }
 0x1bd   : > { %v965_v29 = vadd.f32 %v1833_v6, %v768_v26  ;;  %v612_v30 = vpop.f32.mrb[6].mxu1 }
 0x1be   : > { %v966_v31 = vadd.f32 %v1835_v9, %v770_v28  ;;  %v773_v32 = vpop.f32.mrb[6].mxu0  ;;  %v614_v33 = vpop.f32.mrb[7].mxu1 }
 0x1bf   : > { %997 = vst [vmem:[%s1839_s10 + $0x20] sm:$0xff] %v965_v29  ;;  %v774_v34 = vadd.f32 %v773_v32, %v612_v30  ;;  %v775_v35 = vpop.f32.mrb[7].mxu0 }
 0x1c0   : > { %998 = vst [vmem:[%s1839_s10 + $0x28] sm:$0xff] %v966_v31  ;;  %v776_v36 = vadd.f32 %v775_v35, %v614_v33 }
 0x1c1   : > { %v967_v37 = vadd.f32 %v1833_v6, %v774_v34  ;;  %v618_v38 = vpop.f32.mrb[8].mxu1 }
 0x1c2   : > { %v968_v39 = vadd.f32 %v1835_v9, %v776_v36  ;;  %v779_v40 = vpop.f32.mrb[8].mxu0  ;;  %v620_v41 = vpop.f32.mrb[9].mxu1 }
 0x1c3   : > { %999 = vst [vmem:[%s1839_s10 + $0x30] sm:$0xff] %v967_v37  ;;  %v780_v42 = vadd.f32 %v779_v40, %v618_v38  ;;  %v781_v43 = vpop.f32.mrb[9].mxu0 }
 0x1c4   : > { %1000 = vst [vmem:[%s1839_s10 + $0x38] sm:$0xff] %v968_v39  ;;  %v782_v44 = vadd.f32 %v781_v43, %v620_v41 }
 0x1c5   : > { %v969_v45 = vadd.f32 %v1833_v6, %v780_v42  ;;  %v624_v46 = vpop.f32.mrb[10].mxu1 }
 0x1c6   : > { %v970_v47 = vadd.f32 %v1835_v9, %v782_v44  ;;  %v785_v48 = vpop.f32.mrb[10].mxu0  ;;  %v626_v49 = vpop.f32.mrb[11].mxu1 }
 0x1c7   : > { %1001 = vst [vmem:[%s1839_s10 + $0x40] sm:$0xff] %v969_v45  ;;  %v786_v50 = vadd.f32 %v785_v48, %v624_v46  ;;  %v787_v51 = vpop.f32.mrb[11].mxu0 }
 0x1c8   : > { %1002 = vst [vmem:[%s1839_s10 + $0x48] sm:$0xff] %v970_v47  ;;  %v788_v52 = vadd.f32 %v787_v51, %v626_v49 }
 0x1c9   : > { %v971_v53 = vadd.f32 %v1833_v6, %v786_v50  ;;  %v630_v54 = vpop.f32.mrb[12].mxu1 }
 0x1ca   : > { %v972_v55 = vadd.f32 %v1835_v9, %v788_v52  ;;  %v791_v56 = vpop.f32.mrb[12].mxu0  ;;  %v632_v57 = vpop.f32.mrb[13].mxu1 }
 0x1cb   : > { %1003 = vst [vmem:[%s1839_s10 + $0x50] sm:$0xff] %v971_v53  ;;  %v792_v58 = vadd.f32 %v791_v56, %v630_v54  ;;  %v793_v59 = vpop.f32.mrb[13].mxu0 }
 0x1cc   : > { %1004 = vst [vmem:[%s1839_s10 + $0x58] sm:$0xff] %v972_v55  ;;  %v794_v60 = vadd.f32 %v793_v59, %v632_v57 }
 0x1cd   : > { %v973_v61 = vadd.f32 %v1833_v6, %v792_v58  ;;  %v636_v62 = vpop.f32.mrb[14].mxu1 }
 0x1ce   : > { %v974_v63 = vadd.f32 %v1835_v9, %v794_v60  ;;  %v797_v0 = vpop.f32.mrb[14].mxu0  ;;  %v638_v1 = vpop.f32.mrb[15].mxu1 }
 0x1cf   : > { %1005 = vst [vmem:[%s1839_s10 + $0x60] sm:$0xff] %v973_v61  ;;  %v798_v2 = vadd.f32 %v797_v0, %v636_v62  ;;  %v799_v3 = vpop.f32.mrb[15].mxu0 }
 0x1d0   : > { %1006 = vst [vmem:[%s1839_s10 + $0x68] sm:$0xff] %v974_v63  ;;  %v800_v4 = vadd.f32 %v799_v3, %v638_v1 }
 0x1d1   : > { %v975_v5 = vadd.f32 %v1833_v6, %v798_v2  ;;  %v642_v7 = vpop.f32.mrb[16].mxu1 }
 0x1d2   : > { %v976_v8 = vadd.f32 %v1835_v9, %v800_v4  ;;  %v803_v10 = vpop.f32.mrb[16].mxu0  ;;  %v644_v11 = vpop.f32.mrb[17].mxu1 }
 0x1d3   : > { %1007 = vst [vmem:[%s1839_s10 + $0x70] sm:$0xff] %v975_v5  ;;  %v804_v12 = vadd.f32 %v803_v10, %v642_v7  ;;  %v805_v13 = vpop.f32.mrb[17].mxu0 }
 0x1d4   : > { %1008 = vst [vmem:[%s1839_s10 + $0x78] sm:$0xff] %v976_v8  ;;  %v806_v14 = vadd.f32 %v805_v13, %v644_v11 }
 0x1d5   : > { %v977_v15 = vadd.f32 %v1833_v6, %v804_v12  ;;  %v648_v16 = vpop.f32.mrb[18].mxu1 }
 0x1d6   : > { %v978_v17 = vadd.f32 %v1835_v9, %v806_v14  ;;  %v809_v18 = vpop.f32.mrb[18].mxu0  ;;  %v650_v19 = vpop.f32.mrb[19].mxu1 }
 0x1d7   : > { %1009 = vst [vmem:[%s1839_s10 + $0x80] sm:$0xff] %v977_v15  ;;  %v810_v20 = vadd.f32 %v809_v18, %v648_v16  ;;  %v811_v21 = vpop.f32.mrb[19].mxu0 }
 0x1d8   : > { %1010 = vst [vmem:[%s1839_s10 + $0x88] sm:$0xff] %v978_v17  ;;  %v812_v22 = vadd.f32 %v811_v21, %v650_v19 }
 0x1d9   : > { %v979_v23 = vadd.f32 %v1833_v6, %v810_v20  ;;  %v654_v24 = vpop.f32.mrb[20].mxu1 }
 0x1da   : > { %v980_v25 = vadd.f32 %v1835_v9, %v812_v22  ;;  %v815_v26 = vpop.f32.mrb[20].mxu0  ;;  %v656_v27 = vpop.f32.mrb[21].mxu1 }
 0x1db   : > { %1011 = vst [vmem:[%s1839_s10 + $0x90] sm:$0xff] %v979_v23  ;;  %v816_v28 = vadd.f32 %v815_v26, %v654_v24  ;;  %v817_v29 = vpop.f32.mrb[21].mxu0 }
 0x1dc   : > { %1012 = vst [vmem:[%s1839_s10 + $0x98] sm:$0xff] %v980_v25  ;;  %v818_v30 = vadd.f32 %v817_v29, %v656_v27 }
 0x1dd   : > { %v981_v31 = vadd.f32 %v1833_v6, %v816_v28  ;;  %v660_v32 = vpop.f32.mrb[22].mxu1 }
 0x1de   : > { %v982_v33 = vadd.f32 %v1835_v9, %v818_v30  ;;  %v821_v34 = vpop.f32.mrb[22].mxu0  ;;  %v662_v35 = vpop.f32.mrb[23].mxu1 }
 0x1df   : > { %1013 = vst [vmem:[%s1839_s10 + $0xa0] sm:$0xff] %v981_v31  ;;  %v822_v36 = vadd.f32 %v821_v34, %v660_v32  ;;  %v823_v37 = vpop.f32.mrb[23].mxu0 }
 0x1e0   : > { %1014 = vst [vmem:[%s1839_s10 + $0xa8] sm:$0xff] %v982_v33  ;;  %v824_v38 = vadd.f32 %v823_v37, %v662_v35 }
 0x1e1   : > { %v983_v39 = vadd.f32 %v1833_v6, %v822_v36  ;;  %v666_v40 = vpop.f32.mrb[24].mxu1 }
 0x1e2   : > { %v984_v41 = vadd.f32 %v1835_v9, %v824_v38  ;;  %v827_v42 = vpop.f32.mrb[24].mxu0  ;;  %v668_v43 = vpop.f32.mrb[25].mxu1 }
 0x1e3   : > { %1015 = vst [vmem:[%s1839_s10 + $0xb0] sm:$0xff] %v983_v39  ;;  %v828_v44 = vadd.f32 %v827_v42, %v666_v40  ;;  %v829_v45 = vpop.f32.mrb[25].mxu0 }
 0x1e4   : > { %1016 = vst [vmem:[%s1839_s10 + $0xb8] sm:$0xff] %v984_v41  ;;  %v830_v46 = vadd.f32 %v829_v45, %v668_v43 }
 0x1e5   : > { %v985_v47 = vadd.f32 %v1833_v6, %v828_v44  ;;  %v672_v48 = vpop.f32.mrb[26].mxu1 }
 0x1e6   : > { %v986_v49 = vadd.f32 %v1835_v9, %v830_v46  ;;  %v833_v50 = vpop.f32.mrb[26].mxu0  ;;  %v674_v51 = vpop.f32.mrb[27].mxu1 }
 0x1e7   : > { %1017 = vst [vmem:[%s1839_s10 + $0xc0] sm:$0xff] %v985_v47  ;;  %v834_v52 = vadd.f32 %v833_v50, %v672_v48  ;;  %v835_v53 = vpop.f32.mrb[27].mxu0 }
 0x1e8   : > { %1018 = vst [vmem:[%s1839_s10 + $0xc8] sm:$0xff] %v986_v49  ;;  %v836_v54 = vadd.f32 %v835_v53, %v674_v51 }
 0x1e9   : > { %v987_v55 = vadd.f32 %v1833_v6, %v834_v52  ;;  %v678_v56 = vpop.f32.mrb[28].mxu1 }
 0x1ea   : > { %v988_v57 = vadd.f32 %v1835_v9, %v836_v54  ;;  %v839_v58 = vpop.f32.mrb[28].mxu0  ;;  %v680_v59 = vpop.f32.mrb[29].mxu1 }
 0x1eb   : > { %1019 = vst [vmem:[%s1839_s10 + $0xd0] sm:$0xff] %v987_v55  ;;  %v840_v60 = vadd.f32 %v839_v58, %v678_v56  ;;  %v841_v61 = vpop.f32.mrb[29].mxu0 }
 0x1ec   : > { %1020 = vst [vmem:[%s1839_s10 + $0xd8] sm:$0xff] %v988_v57  ;;  %v842_v62 = vadd.f32 %v841_v61, %v680_v59 }
 0x1ed   : > { %v989_v63 = vadd.f32 %v1833_v6, %v840_v60  ;;  %v684_v0 = vpop.f32.mrb[30].mxu1 }
 0x1ee   : > { %v990_v1 = vadd.f32 %v1835_v9, %v842_v62  ;;  %v845_v2 = vpop.f32.mrb[30].mxu0  ;;  %v686_v3 = vpop.f32.mrb[31].mxu1 }
 0x1ef   : > { %1021 = vst [vmem:[%s1839_s10 + $0xe0] sm:$0xff] %v989_v63  ;;  %v846_v4 = vadd.f32 %v845_v2, %v684_v0  ;;  %v847_v5 = vpop.f32.mrb[31].mxu0 }
 0x1f0   : > { %1022 = vst [vmem:[%s1839_s10 + $0xe8] sm:$0xff] %v990_v1  ;;  %v848_v7 = vadd.f32 %v847_v5, %v686_v3 }
 0x1f1   : > { %v991_v8 = vadd.f32 %v1833_v6, %v846_v4 }
 0x1f2   : > { %v992_v10 = vadd.f32 %v1835_v9, %v848_v7 }
 0x1f3   : > { %1023 = vst [vmem:[%s1839_s10 + $0xf0] sm:$0xff] %v991_v8 }
 0x1f4   : > { %1024 = vst [vmem:[%s1839_s10 + $0xf8] sm:$0xff] %v992_v10 }
 0x1f5   : > { %1491 = shalt.err (!%p1488_p5)
}
 0x1f6   : > { %s1492_s29 = scalar_lea.hbm %s1905_s25, 4096  ;;  %s1496_s20 = scalar_lea.hbm %s1962_s3, 8192 }
 0x1f7   : > { %p1493_p9 = scmp.ne.s32.totalorder %s1905_s25, %s1492_s29  ;;  %p1497_p3 = scmp.lt.u32.totalorder %s1905_s25, %s1962_s3 }
 0x1f8   : > { %p1498_p7 = scmp.lt.u32.totalorder %s1496_s20, %s1492_s29  ;;  %p1500_p4 = scmp.lt.u32.totalorder %s1492_s29, %s1905_s25 }
 0x1f9   : > { %p1494_p1 = pnand %p1493_p9, %p1692_p10 }
 0x1fa   : > { %p1499_p13 = por %p1498_p7, %p1497_p3 }
 0x1fb   : > { %p1495_p2 = pneg %p1494_p1 }
 0x1fc   : > { %p1501_p6 = por %p1500_p4, %p1499_p13 }
 0x1fe   : > { %p1502_p8 = pnand %p1501_p6, %p1495_p2 }
 0x200   : > { %1505 = shalt.err (!%p1502_p8)
}
 0x201   : > { %s1571_s10 = smov 256   ;;  %s1572_s11 = smov 16  }
 0x202   : > { %1349 = dma.vmem_to_hbm [thread:$0]  (%p1692_p10), %s1907_s9, 4096, %s1905_s25, %s1026_s15, %s1571_s10, %s1571_s10, %s1572_s11  }
 0x203 PF: > { %s1057_s18 = sand.u32 1, %s1544_s12   ;;  %p1980_p12 = scmp.ne.s32.totalorder %s1970_s23, 0 }
 0x204   : > { %p1981_p11 = scmp.ge.s32.totalorder %s1564_s17, 2  ;;  %s1058_s19 = scalar_lea.sflag [#allocation5], %s1057_s18 }
 0x206   : > { %p1360_p0 = pnand %p1981_p11, %p1980_p12 }
 0x208   : > { %1539 = dma.done.wait (!%p1360_p0), %s1058_s19, 4096  }
 0x209   : > { %1541 = vsyncadd (!%p1360_p0), %s1058_s19, 4294963200  ;;  %s20_s17 = sadd.s32 1, %s1564_s17   ;;  %s1982_s12 = smov %s1548_s13 }
 0x20a   : > { %p17_p5 = scmp.ge.s32.totalorder %s20_s17, 4   ;;  %s1983_s13 = smov %s1552_s14 }
 0x20b   : > { %s1984_s14 = smov %s1701_s5  ;;  %s1985_s15 = smov %s1560_s16 }
 0x20c   : > { %s1986_s16 = smov %s1988_s28  ;;  %19 = sbr.rel (!%p17_p5) target bundleno = 7 (0x7), region = 93 }
 0x213   :  { %1063 = vsyncpa [#allocation4], 1 }
 0x214   :  { %1065 = vsyncpa [#allocation4 + $0x1], 1 }
 0x215   :  { %1066 = vsyncpa [#allocation7], 1 }
 0x216   :  { %1067 = vsyncpa [#allocation5], 1 }
 0x217   :  { %1069 = vsyncpa [#allocation5 + $0x1], 1 }

</bundles_post_ra>
